<compile_context>
chip_gen: v5e
topology: v5e:2x2
jax: 0.10.0
libtpu: 0.0.40
codegen_flags: <defaults>
</compile_context>

<pallas_src>
import functools

import jax
import jax.numpy as jnp
from jax.experimental import pallas as pl
from jax.experimental.pallas import tpu as pltpu

_LANE = 128


# ---------------------------------------------------------------------------
# kernels
# ---------------------------------------------------------------------------

def _bn_stats_kernel(x_ref, g_ref, b_ref, rm_ref, rv_ref,      # inputs
                     stats_ref,                                  # output (c_blk, 4)
                     sum_acc, sq_acc,                            # scratch (c_blk, 1) f32
                     *, eps, momentum, count):
    """Pass 1: accumulate per-channel sum / sum(x^2) over the (batch, spatial)
    reduction axes; on the last reduction tile emit one packed (c_blk, 4)
    block: [scale | shift | new_running_mean | new_running_var]."""
    n_idx = pl.program_id(1)
    s_idx = pl.program_id(2)

    @pl.when(jnp.logical_and(n_idx == 0, s_idx == 0))
    def _init():
        sum_acc[...] = jnp.zeros_like(sum_acc)
        sq_acc[...] = jnp.zeros_like(sq_acc)

    xf = x_ref[...].astype(jnp.float32)                # (n_blk, c_blk, s_blk)
    part_sum = jnp.sum(xf, axis=2, keepdims=True)      # (n_blk, c_blk, 1)
    part_sq = jnp.sum(xf * xf, axis=2, keepdims=True)
    sum_acc[...] += jnp.sum(part_sum, axis=0)          # (c_blk, 1)
    sq_acc[...] += jnp.sum(part_sq, axis=0)

    @pl.when(jnp.logical_and(n_idx == pl.num_programs(1) - 1,
                             s_idx == pl.num_programs(2) - 1))
    def _finalize():
        inv_n = 1.0 / count
        mu = sum_acc[...] * inv_n
        # Biased variance (reference module uses unbiased=False both for
        # normalization and for the running-stat update).
        # NOTE: E[x^2]-E[x]^2 in f32; a Welford/shifted accumulation would be
        # numerically safer for extremely large N*H*W or large-mean inputs.
        var = jnp.maximum(sq_acc[...] * inv_n - mu * mu, 0.0)
        inv_std = jax.lax.rsqrt(var + eps)
        scale = g_ref[...] * inv_std                   # folded affine
        shift = b_ref[...] - mu * scale
        new_rm = (1.0 - momentum) * rm_ref[...] + momentum * mu
        new_rv = (1.0 - momentum) * rv_ref[...] + momentum * var
        stats_ref[...] = jnp.concatenate([scale, shift, new_rm, new_rv], axis=1)


def _bn_apply_kernel(x_ref, stats_ref, o_ref):
    """Pass 2: y = x * scale + shift computed in f32, rounded once on store."""
    stats = stats_ref[...]                             # (c_blk, 4) f32
    scale = stats[:, 0:1][None]                        # (1, c_blk, 1)
    shift = stats[:, 1:2][None]
    xf = x_ref[...].astype(jnp.float32)                # (n_blk, c_blk, s_blk)
    o_ref[...] = (xf * scale + shift).astype(o_ref.dtype)


def _bn_fused_kernel(x_ref, g_ref, b_ref, rm_ref, rv_ref, o_ref, stats_ref,
                     *, eps, momentum, count):
    """Small-input fast path: stats + apply with x resident in VMEM."""
    xf = x_ref[...].astype(jnp.float32)                # (N, C, S)
    s1 = jnp.sum(jnp.sum(xf, axis=2, keepdims=True), axis=0)        # (C, 1)
    s2 = jnp.sum(jnp.sum(xf * xf, axis=2, keepdims=True), axis=0)
    inv_n = 1.0 / count
    mu = s1 * inv_n
    var = jnp.maximum(s2 * inv_n - mu * mu, 0.0)
    inv_std = jax.lax.rsqrt(var + eps)
    scale = g_ref[...] * inv_std
    shift = b_ref[...] - mu * scale
    o_ref[...] = (xf * scale[None] + shift[None]).astype(o_ref.dtype)
    new_rm = (1.0 - momentum) * rm_ref[...] + momentum * mu
    new_rv = (1.0 - momentum) * rv_ref[...] + momentum * var
    stats_ref[...] = jnp.concatenate([scale, shift, new_rm, new_rv], axis=1)


# ---------------------------------------------------------------------------
# tile / VMEM budget selection
# ---------------------------------------------------------------------------

def _sublane_quantum(itemsize):
    # packed sublane tile: 8 rows for 4-byte, 16 for 2-byte, 32 for 1-byte dtypes
    return 8 * max(1, 4 // int(itemsize))


def _block_options(total, quantum):
    """Divisors of `total` that are multiples of `quantum`, ascending; fall
    back to the full extent (full dims are always legal blocks)."""
    opts = []
    if total % quantum == 0:
        opts = [d for d in range(quantum, total + 1, quantum) if total % d == 0]
    if not opts:
        opts = [total]
    return opts


def _divisors(n):
    return [d for d in range(1, n + 1) if n % d == 0]


def _vmem_capacity_bytes():
    try:
        return int(getattr(pltpu.get_tpu_info(), "vmem_capacity_bytes", 128 << 20))
    except Exception:  # pragma: no cover - conservative fallback
        return 64 << 20


def _choose_tiles(N, C, S, elem_budget, sublane_q, max_c=None):
    """Largest divisor-based (n_blk, c_blk, s_blk), (sublane,128)-aligned, with
    n*c*s <= elem_budget.  Lanes grow first (big lever), then batch, then
    channels."""
    c_opts = _block_options(C, sublane_q)
    s_opts = _block_options(S, _LANE)
    n_opts = _divisors(N)
    if max_c is not None:
        capped = [c for c in c_opts if c <= max_c]
        if capped:
            c_opts = capped
    n_blk, c_blk, s_blk = 1, c_opts[0], s_opts[0]
    for s in s_opts:
        if n_blk * c_blk * s <= elem_budget:
            s_blk = s
    for n in n_opts:
        if n * c_blk * s_blk <= elem_budget:
            n_blk = n
    for c in c_opts:
        if n_blk * c * s_blk <= elem_budget:
            c_blk = c
    return n_blk, c_blk, s_blk


# ---------------------------------------------------------------------------
# wrapper
# ---------------------------------------------------------------------------

def batchnorm2d_forward(x, gamma, beta, running_mean, running_var,
                        eps=1e-5, momentum=0.1,
                        force_tiled=False, max_block_elems=None):
    """Training-mode BatchNorm2d forward.

    x: (N, C, H, W); gamma/beta/running_*: (C, 1, 1).
    Returns (out NCHW, new_running_mean, new_running_var).
    """
    # TODO(synk): eval-mode branch (normalize with running stats) not implemented.
    N, C, H, W = x.shape
    S = H * W
    x3 = x.reshape(N, C, S)                      # contiguous => free reshape
    itemsize = int(jnp.dtype(x.dtype).itemsize)
    sublane_q = _sublane_quantum(itemsize)
    count = float(N * S)

    cap = _vmem_capacity_bytes()
    # Scoped-VMEM target ~0.75 * physical, never above 64 MiB:
    #   v5e/v6e (128 MiB phys) -> 64 MiB ; v7x (64 MiB phys) -> 48 MiB.
    vmem_target = int(min(cap * 3 // 4, 64 << 20))
    headroom = 4 << 20

    # Per-channel vectors live as (C, 1): channel on the sublane axis.
    g2 = gamma.reshape(C, 1).astype(jnp.float32)
    b2 = beta.reshape(C, 1).astype(jnp.float32)
    rm2 = running_mean.reshape(C, 1).astype(jnp.float32)
    rv2 = running_var.reshape(C, 1).astype(jnp.float32)

    stats_shape = jax.ShapeDtypeStruct((C, 4), jnp.float32)
    kern_kwargs = dict(eps=float(eps), momentum=float(momentum), count=count)

    if (not force_tiled) and N * C * S * itemsize <= (2 << 20):
        # ---------------- small-input fused fast path ----------------
        out3, stats = pl.pallas_call(
            functools.partial(_bn_fused_kernel, **kern_kwargs),
            grid_spec=pltpu.PrefetchScalarGridSpec(
                num_scalar_prefetch=0,
                grid=(1,),
                in_specs=[pl.BlockSpec((N, C, S), lambda i: (0, 0, 0)),
                          pl.BlockSpec((C, 1), lambda i: (0, 0)),
                          pl.BlockSpec((C, 1), lambda i: (0, 0)),
                          pl.BlockSpec((C, 1), lambda i: (0, 0)),
                          pl.BlockSpec((C, 1), lambda i: (0, 0))],
                out_specs=(pl.BlockSpec((N, C, S), lambda i: (0, 0, 0)),
                           pl.BlockSpec((C, 4), lambda i: (0, 0)))),
            out_shape=(jax.ShapeDtypeStruct((N, C, S), x.dtype), stats_shape),
            compiler_params=pltpu.CompilerParams(
                dimension_semantics=("arbitrary",),
                vmem_limit_bytes=vmem_target),
        )(x3, g2, b2, rm2, rv2)
    else:
        # ---- pass 1: per-channel stats.  Only x is double-buffered here, so
        #      its block budget is ~2x the apply pass (capped at 16 MiB). ----
        stats_budget = min((vmem_target - headroom) // (2 * itemsize + 8),
                           (16 << 20) // itemsize)
        stats_budget = max(stats_budget, sublane_q * _LANE)
        if max_block_elems is not None:
            stats_budget = min(stats_budget, max_block_elems)
        # Cap channel block at C/2 where possible so the "parallel" grid axis
        # has >= 2 tiles (keeps both v7x TensorCores busy in the stats sweep).
        n1, c1, s1 = _choose_tiles(N, C, S, stats_budget, sublane_q,
                                   max_c=max(C // 2, 1))
        grid1 = (C // c1, N // n1, S // s1)
        stats_fp = n1 * c1 * s1 * (2 * itemsize + 8) + headroom
        x_spec1 = pl.BlockSpec((n1, c1, s1), lambda c, n, s: (n, c, s))
        chan_spec1 = pl.BlockSpec((c1, 1), lambda c, n, s: (c, 0))
        stats = pl.pallas_call(
            functools.partial(_bn_stats_kernel, **kern_kwargs),
            grid_spec=pltpu.PrefetchScalarGridSpec(
                num_scalar_prefetch=0,
                grid=grid1,
                in_specs=[x_spec1, chan_spec1, chan_spec1, chan_spec1, chan_spec1],
                out_specs=pl.BlockSpec((c1, 4), lambda c, n, s: (c, 0)),
                scratch_shapes=[pltpu.VMEM((c1, 1), jnp.float32),
                                pltpu.VMEM((c1, 1), jnp.float32)]),
            out_shape=stats_shape,
            compiler_params=pltpu.CompilerParams(
                dimension_semantics=("parallel", "arbitrary", "arbitrary"),
                vmem_limit_bytes=int(min(max(vmem_target, stats_fp), cap * 7 // 8))),
        )(x3, g2, b2, rm2, rv2)

        # ---- pass 2: elementwise normalize (x in + y out double-buffered,
        #      ~8 MiB blocks on v5e/v6e, ~6-8 MiB on v7x). ----
        apply_budget = min((vmem_target - headroom) // (4 * itemsize + 8),
                           (8 << 20) // itemsize)
        apply_budget = max(apply_budget, sublane_q * _LANE)
        if max_block_elems is not None:
            apply_budget = min(apply_budget, max_block_elems)
        n2, c2, s2 = _choose_tiles(N, C, S, apply_budget, sublane_q)
        grid2 = (C // c2, N // n2, S // s2)
        apply_fp = n2 * c2 * s2 * (4 * itemsize + 8) + headroom
        x_spec2 = pl.BlockSpec((n2, c2, s2), lambda c, n, s: (n, c, s))
        out3 = pl.pallas_call(
            _bn_apply_kernel,
            grid_spec=pltpu.PrefetchScalarGridSpec(
                num_scalar_prefetch=0,
                grid=grid2,
                in_specs=[x_spec2,
                          pl.BlockSpec((c2, 4), lambda c, n, s: (c, 0))],
                out_specs=x_spec2),
            out_shape=jax.ShapeDtypeStruct((N, C, S), x.dtype),
            compiler_params=pltpu.CompilerParams(
                dimension_semantics=("parallel", "parallel", "parallel"),
                vmem_limit_bytes=int(min(max(vmem_target, apply_fp), cap * 7 // 8))),
        )(x3, stats)

    out = out3.reshape(N, C, H, W)               # free reshape back
    new_rm = stats[:, 2].reshape(C, 1, 1).astype(running_mean.dtype)
    new_rv = stats[:, 3].reshape(C, 1, 1).astype(running_var.dtype)
    return out, new_rm, new_rv


# ---------------------------------------------------------------------------
# self-test
# ---------------------------------------------------------------------------

def _reference(x, gamma, beta, running_mean, running_var, eps=1e-5, momentum=0.1):
    mu = jnp.mean(x, axis=(0, 2, 3), keepdims=True)
    var = jnp.mean((x - mu) ** 2, axis=(0, 2, 3), keepdims=True)   # biased
    out = gamma[None] * (x - mu) / jnp.sqrt(var + eps) + beta[None]
    rm = (1.0 - momentum) * running_mean + momentum * mu[0]
    rv = (1.0 - momentum) * running_var + momentum * var[0]
    return out, rm, rv


if __name__ == "__main__":
    key = jax.random.PRNGKey(0)
    k1, k2, k3, k4, k5 = jax.random.split(key, 5)

    # case 1: module-sized input -> exercises the fused small-input fast path
    N, C, H, W = 2, 4, 16, 16
    x = jax.random.normal(k1, (N, C, H, W), dtype=jnp.float32)
    gamma = jnp.ones((C, 1, 1), jnp.float32)
    beta = jnp.zeros((C, 1, 1), jnp.float32)
    rm = jnp.zeros((C, 1, 1), jnp.float32)
    rv = jnp.ones((C, 1, 1), jnp.float32)
    out, nrm, nrv = batchnorm2d_forward(x, gamma, beta, rm, rv)
    jax.block_until_ready((out, nrm, nrv))
    out_r, rm_r, rv_r = _reference(x, gamma, beta, rm, rv)
    assert jnp.allclose(out, out_r, atol=1e-4), "fused: output mismatch"
    assert jnp.allclose(nrm, rm_r, atol=1e-4), "fused: running_mean mismatch"
    assert jnp.allclose(nrv, rv_r, atol=1e-4), "fused: running_var mismatch"

    # case 2: same semantics through the tiled two-pass path, with forced
    # small blocks so the multi-tile accumulation / grid machinery is tested.
    N, C, H, W = 2, 16, 16, 16
    x = jax.random.normal(k2, (N, C, H, W), dtype=jnp.float32)
    gamma = (0.5 + jax.random.uniform(k3, (C, 1, 1))).astype(jnp.float32)
    beta = jax.random.normal(k4, (C, 1, 1), dtype=jnp.float32)
    rm = jax.random.normal(k5, (C, 1, 1), dtype=jnp.float32)
    rv = jnp.ones((C, 1, 1), jnp.float32)
    out, nrm, nrv = batchnorm2d_forward(x, gamma, beta, rm, rv,
                                        force_tiled=True,
                                        max_block_elems=8 * 128)
    jax.block_until_ready((out, nrm, nrv))
    out_r, rm_r, rv_r = _reference(x, gamma, beta, rm, rv)
    assert jnp.allclose(out, out_r, atol=1e-4), "tiled: output mismatch"
    assert jnp.allclose(nrm, rm_r, atol=1e-4), "tiled: running_mean mismatch"
    assert jnp.allclose(nrv, rv_r, atol=1e-4), "tiled: running_var mismatch"

    print("KERNEL_OK")
</pallas_src>

<mosaic_0001>
module attributes {stable_mosaic.version = 11 : i64} {
  func.func @_bn_fused_kernel(%arg0: i32, %arg1: memref<2x4x256xf32, #tpu.memory_space<vmem>>, %arg2: memref<4x1xf32, #tpu.memory_space<vmem>>, %arg3: memref<4x1xf32, #tpu.memory_space<vmem>>, %arg4: memref<4x1xf32, #tpu.memory_space<vmem>>, %arg5: memref<4x1xf32, #tpu.memory_space<vmem>>, %arg6: memref<2x4x256xf32, #tpu.memory_space<vmem>>, %arg7: memref<4x4xf32, #tpu.memory_space<vmem>>) attributes {dimension_semantics = [#tpu.dimension_semantics<arbitrary>], iteration_bounds = array<i64: 1>, scalar_prefetch = 0 : i64, scratch_operands = 0 : i64, tpu.core_type = #tpu.core_type<tc>, window_params = [{pipeline_mode = #tpu.pipeline_mode<synchronous>, transform_indices = @transform_0, window_bounds = array<i64: 2, 4, 256>}, {pipeline_mode = #tpu.pipeline_mode<synchronous>, transform_indices = @transform_1, window_bounds = array<i64: 4, 1>}, {pipeline_mode = #tpu.pipeline_mode<synchronous>, transform_indices = @transform_2, window_bounds = array<i64: 4, 1>}, {pipeline_mode = #tpu.pipeline_mode<synchronous>, transform_indices = @transform_3, window_bounds = array<i64: 4, 1>}, {pipeline_mode = #tpu.pipeline_mode<synchronous>, transform_indices = @transform_4, window_bounds = array<i64: 4, 1>}, {pipeline_mode = #tpu.pipeline_mode<synchronous>, transform_indices = @transform_5, window_bounds = array<i64: 2, 4, 256>}, {pipeline_mode = #tpu.pipeline_mode<synchronous>, transform_indices = @transform_6, window_bounds = array<i64: 4, 4>}]} {
    %c0 = arith.constant 0 : index
    %c0_0 = arith.constant 0 : index
    %c0_1 = arith.constant 0 : index
    %0 = vector.load %arg1[%c0, %c0_0, %c0_1] : memref<2x4x256xf32, #tpu.memory_space<vmem>>, vector<2x4x256xf32>
    %cst = arith.constant dense<0.000000e+00> : vector<2x4xf32>
    %1 = vector.multi_reduction <add>, %0, %cst [2] : vector<2x4x256xf32> to vector<2x4xf32>
    %2 = vector.shape_cast %1 : vector<2x4xf32> to vector<2x4x1xf32>
    %cst_2 = arith.constant dense<0.000000e+00> : vector<4x1xf32>
    %3 = vector.multi_reduction <add>, %2, %cst_2 [0] : vector<2x4x1xf32> to vector<4x1xf32>
    %4 = arith.mulf %0, %0 : vector<2x4x256xf32>
    %cst_3 = arith.constant dense<0.000000e+00> : vector<2x4xf32>
    %5 = vector.multi_reduction <add>, %4, %cst_3 [2] : vector<2x4x256xf32> to vector<2x4xf32>
    %6 = vector.shape_cast %5 : vector<2x4xf32> to vector<2x4x1xf32>
    %cst_4 = arith.constant dense<0.000000e+00> : vector<4x1xf32>
    %7 = vector.multi_reduction <add>, %6, %cst_4 [0] : vector<2x4x1xf32> to vector<4x1xf32>
    %cst_5 = arith.constant 0.001953125 : f32
    %8 = vector.broadcast %cst_5 : f32 to vector<4x1xf32>
    %9 = arith.mulf %3, %8 : vector<4x1xf32>
    %cst_6 = arith.constant 0.001953125 : f32
    %10 = vector.broadcast %cst_6 : f32 to vector<4x1xf32>
    %11 = arith.mulf %7, %10 : vector<4x1xf32>
    %12 = arith.mulf %9, %9 : vector<4x1xf32>
    %13 = arith.subf %11, %12 : vector<4x1xf32>
    %cst_7 = arith.constant 0.000000e+00 : f32
    %14 = vector.broadcast %cst_7 : f32 to vector<4x1xf32>
    %15 = arith.maximumf %13, %14 : vector<4x1xf32>
    %cst_8 = arith.constant 9.99999974E-6 : f32
    %16 = vector.broadcast %cst_8 : f32 to vector<4x1xf32>
    %17 = arith.addf %15, %16 : vector<4x1xf32>
    %18 = math.rsqrt %17 : vector<4x1xf32>
    %c0_9 = arith.constant 0 : index
    %c0_10 = arith.constant 0 : index
    %19 = vector.load %arg2[%c0_9, %c0_10] : memref<4x1xf32, #tpu.memory_space<vmem>>, vector<4x1xf32>
    %20 = arith.mulf %19, %18 : vector<4x1xf32>
    %c0_11 = arith.constant 0 : index
    %c0_12 = arith.constant 0 : index
    %21 = vector.load %arg3[%c0_11, %c0_12] : memref<4x1xf32, #tpu.memory_space<vmem>>, vector<4x1xf32>
    %22 = arith.mulf %9, %20 : vector<4x1xf32>
    %23 = arith.subf %21, %22 : vector<4x1xf32>
    %24 = vector.shape_cast %20 : vector<4x1xf32> to vector<1x4x1xf32>
    %25 = vector.broadcast %24 : vector<1x4x1xf32> to vector<2x4x256xf32>
    %26 = arith.mulf %0, %25 : vector<2x4x256xf32>
    %27 = vector.shape_cast %23 : vector<4x1xf32> to vector<1x4x1xf32>
    %28 = vector.broadcast %27 : vector<1x4x1xf32> to vector<2x4x256xf32>
    %29 = arith.addf %26, %28 : vector<2x4x256xf32>
    %c0_13 = arith.constant 0 : index
    %c0_14 = arith.constant 0 : index
    %c0_15 = arith.constant 0 : index
    %30 = vector.load %arg6[%c0_13, %c0_14, %c0_15] : memref<2x4x256xf32, #tpu.memory_space<vmem>>, vector<2x4x256xf32>
    tpu.vector_store %arg6[%c0_13, %c0_14, %c0_15], %29 {strides = array<i32>} : memref<2x4x256xf32, #tpu.memory_space<vmem>>, vector<2x4x256xf32>,
    %c0_16 = arith.constant 0 : index
    %c0_17 = arith.constant 0 : index
    %31 = vector.load %arg4[%c0_16, %c0_17] : memref<4x1xf32, #tpu.memory_space<vmem>>, vector<4x1xf32>
    %cst_18 = arith.constant 0.899999976 : f32
    %32 = vector.broadcast %cst_18 : f32 to vector<4x1xf32>
    %33 = arith.mulf %32, %31 : vector<4x1xf32>
    %cst_19 = arith.constant 1.000000e-01 : f32
    %34 = vector.broadcast %cst_19 : f32 to vector<4x1xf32>
    %35 = arith.mulf %34, %9 : vector<4x1xf32>
    %36 = arith.addf %33, %35 : vector<4x1xf32>
    %c0_20 = arith.constant 0 : index
    %c0_21 = arith.constant 0 : index
    %37 = vector.load %arg5[%c0_20, %c0_21] : memref<4x1xf32, #tpu.memory_space<vmem>>, vector<4x1xf32>
    %cst_22 = arith.constant 0.899999976 : f32
    %38 = vector.broadcast %cst_22 : f32 to vector<4x1xf32>
    %39 = arith.mulf %38, %37 : vector<4x1xf32>
    %cst_23 = arith.constant 1.000000e-01 : f32
    %40 = vector.broadcast %cst_23 : f32 to vector<4x1xf32>
    %41 = arith.mulf %40, %15 : vector<4x1xf32>
    %42 = arith.addf %39, %41 : vector<4x1xf32>
    %43 = tpu.concatenate %20, %23, %36, %42 in 1 : vector<4x1xf32>, vector<4x1xf32>, vector<4x1xf32>, vector<4x1xf32> -> vector<4x4xf32>
    %c0_24 = arith.constant 0 : index
    %c0_25 = arith.constant 0 : index
    %44 = vector.load %arg7[%c0_24, %c0_25] : memref<4x4xf32, #tpu.memory_space<vmem>>, vector<4x4xf32>
    tpu.vector_store %arg7[%c0_24, %c0_25], %43 {strides = array<i32>} : memref<4x4xf32, #tpu.memory_space<vmem>>, vector<4x4xf32>,
    return
  }
  func.func @transform_0(%arg0: i32) -> (i32, i32, i32) {
    %c0_i32 = arith.constant 0 : i32
    %c0_i32_0 = arith.constant 0 : i32
    %c0_i32_1 = arith.constant 0 : i32
    %c0_i32_2 = arith.constant 0 : i32
    return %c0_i32, %c0_i32_0, %c0_i32_1 : i32, i32, i32
  }
  func.func @transform_1(%arg0: i32) -> (i32, i32) {
    %c0_i32 = arith.constant 0 : i32
    %c0_i32_0 = arith.constant 0 : i32
    %c0_i32_1 = arith.constant 0 : i32
    return %c0_i32, %c0_i32_0 : i32, i32
  }
  func.func @transform_2(%arg0: i32) -> (i32, i32) {
    %c0_i32 = arith.constant 0 : i32
    %c0_i32_0 = arith.constant 0 : i32
    %c0_i32_1 = arith.constant 0 : i32
    return %c0_i32, %c0_i32_0 : i32, i32
  }
  func.func @transform_3(%arg0: i32) -> (i32, i32) {
    %c0_i32 = arith.constant 0 : i32
    %c0_i32_0 = arith.constant 0 : i32
    %c0_i32_1 = arith.constant 0 : i32
    return %c0_i32, %c0_i32_0 : i32, i32
  }
  func.func @transform_4(%arg0: i32) -> (i32, i32) {
    %c0_i32 = arith.constant 0 : i32
    %c0_i32_0 = arith.constant 0 : i32
    %c0_i32_1 = arith.constant 0 : i32
    return %c0_i32, %c0_i32_0 : i32, i32
  }
  func.func @transform_5(%arg0: i32) -> (i32, i32, i32) {
    %c0_i32 = arith.constant 0 : i32
    %c0_i32_0 = arith.constant 0 : i32
    %c0_i32_1 = arith.constant 0 : i32
    %c0_i32_2 = arith.constant 0 : i32
    return %c0_i32, %c0_i32_0, %c0_i32_1 : i32, i32, i32
  }
  func.func @transform_6(%arg0: i32) -> (i32, i32) {
    %c0_i32 = arith.constant 0 : i32
    %c0_i32_0 = arith.constant 0 : i32
    %c0_i32_1 = arith.constant 0 : i32
    return %c0_i32, %c0_i32_0 : i32, i32
  }
}

</mosaic_0001>

<bundles_post_ra>
// kernel: tpu_custom_call.1
= control target key start
LH: loop header
LB: loop body
LE: loop exit
PB: predicated region body
PF: predicated region fallthrough
CT: control target
= control target key end

     0   :  { %12 = vsyncpa [#allocation3], 0  ;;  %s392_s0 = inlined_call_operand.hbm [shape: f32[2,4,256], index: 0, kind: input, shape index: {}]   ;;  %s393_s1 = inlined_call_operand.vmem [shape: f32[4,1], index: 1, kind: input, shape index: {}]   ;;  %s394_s2 = inlined_call_operand.vmem [shape: f32[4,1], index: 2, kind: input, shape index: {}]   ;;  %s395_s3 = inlined_call_operand.vmem [shape: f32[4,1], index: 3, kind: input, shape index: {}]   ;;  %s396_s4 = inlined_call_operand.vmem [shape: f32[4,1], index: 4, kind: input, shape index: {}]   ;;  %s397_s5 = inlined_call_operand.hbm [shape: f32[2,4,256], index: 5, kind: output, shape index: {0}]   ;;  %s398_s6 = inlined_call_operand.hbm [shape: f32[4,4], index: 6, kind: output, shape index: {1}]  }
   0x1   :  { %13 = vsyncpa [#allocation4], 0 }
   0x2   :  { %14 = vsyncpa [#allocation7], 0  ;;  %s19_s23 = sshll.u32 %s392_s0, 4  ;;  %s296_s24 = smov [#allocation2]   ;;  %s20_s23 = int_to_ptr.hbm [resolvable:$true] %s19_s23 }
   0x3   :  { %s21_s25 = sshll.u32 %s296_s24, 4  ;;  %s297_s26 = smov 128   ;;  %s22_s25 = int_to_ptr.vmem [resolvable:$true] %s21_s25 }
   0x4   :  { %s298_s27 = smov 8  }
   0x5   :  { %27 = dma.hbm_to_vmem [thread:$0]  %s20_s23, 256, %s22_s25, [#allocation3], %s297_s26, %s297_s26, %s298_s27  }
   0x6   :  { %290 = dma.done.wait [#allocation3], 256  }
   0x7   :  { %291 = vsyncadd [#allocation3], 4294967040  ;;  %v347_v0 = vld [vmem:[#allocation2] sm:$0xff]  ;;  %v349_v1 = vld [vmem:[#allocation2 + $0x8] sm:$0xff]  ;;  %vm55_vm0 = vcmask 1043456   ;;  %v299_v25 = vmov 0  }
   0x8   :  { %44 = vst [vmem:[#allocation1] ss:$2 sm:$0xff] %v347_v0  ;;  %v69_v2 = vmul.f32 %v347_v0, %v347_v0  ;;  %v70_v3 = vmul.f32 %v349_v1, %v349_v1  ;;  %214 = vset.pattern.permute.xlu2 %v299_v25  ;;  %215 = vset.pattern.permute.xlu0 %v299_v25  ;;  %v142_v30 = vld [vmem:[%s395_s3] sm:$0xf]  ;;  %s300_s29 = smov 2   ;;  %s301_s9 = smov 1  }
   0x9   :  { %48 = vst [vmem:[#allocation1 + $0x10] ss:$2 sm:$0xff] %v349_v1  ;;  %v143_v33 = vmul.f32 0.9, %v142_v30  ;;  %v113_v51 = vld [vmem:[%s393_s1] sm:$0xf] }
   0xa   :  { %v115_v54 = vld [vmem:[%s394_s2] sm:$0xf]  ;;  %s302_s1 = smov 3   ;;  %v303_v61 = vmov 839922192   ;;  %s304_s2 = smov [#allocation5]  }
   0xb   :  { %v146_v57 = vld [vmem:[%s396_s4] sm:$0xf]  ;;  %v123_v62 = vunpack.c.l.s4 %v303_v61  ;;  %s173_s12 = sshll.u32 %s304_s2, 4  ;;  %s175_s14 = sshll.u32 %s397_s5, 4  ;;  %vm161_vm4 = vcmask 7168   ;;  %vm163_vm5 = vcmask 15360   ;;  %s174_s12 = int_to_ptr.vmem [resolvable:$true] %s173_s12  ;;  %s176_s14 = int_to_ptr.hbm [resolvable:$true] %s175_s14 }
   0xc   :  { %v147_v58 = vmul.f32 0.9, %v146_v57  ;;  %s305_s15 = smov [#allocation6]   ;;  %s189_s19 = sshll.u32 %s398_s6, 4  ;;  %vm165_vm6 = vcmask 23552   ;;  %vm167_vm7 = vcmask 27648   ;;  %s190_s19 = int_to_ptr.hbm [resolvable:$true] %s189_s19 }
   0xd   :  { %s187_s16 = sshll.u32 %s305_s15, 4  ;;  %s188_s16 = int_to_ptr.vmem [resolvable:$true] %s187_s16 }
   0xf   :  { %v45_v4 = vld.sshfl [vmem:[#allocation1] sm:$0xff pattern:$0x75316420]  ;;  %v46_v5 = vld.sshfl [vmem:[#allocation1 + $0x8] sm:$0xff pattern:$0x75316420] }
  0x10   :  { %v56_v6 = vsel %vm55_vm0, %v45_v4, 0.0  ;;  %v57_v7 = vsel %vm55_vm0, %v46_v5, 0.0  ;;  %73 = vst [vmem:[#allocation1] ss:$2 sm:$0xff] %v69_v2  ;;  %v124_v2 = vunpack.c.0.s8 %v123_v62 }
  0x11   :  { %v58_v8 = vadd.f32 %v57_v7, %v56_v6  ;;  %v49_v9 = vld.sshfl [vmem:[#allocation1 + $0x10] sm:$0xff pattern:$0x75316420]  ;;  %v50_v10 = vld.sshfl [vmem:[#allocation1 + $0x18] sm:$0xff pattern:$0x75316420] }
  0x12   :  { %77 = vst [vmem:[#allocation1 + $0x10] ss:$2 sm:$0xff] %v70_v3  ;;  %v61_v11 = vsel %vm55_vm0, %v49_v9, 0.0  ;;  %v62_v12 = vsel %vm55_vm0, %v50_v10, 0.0 }
  0x13   :  { %59 = vadd.xlane.f32.xlu0 %v58_v8  ;;  %v63_v15 = vadd.f32 %v62_v12, %v61_v11 }
  0x17   :  { %v74_v13 = vld.sshfl [vmem:[#allocation1] sm:$0xff pattern:$0x75316420]  ;;  %v75_v14 = vld.sshfl [vmem:[#allocation1 + $0x8] sm:$0xff pattern:$0x75316420] }
  0x18   :  { %v84_v16 = vsel %vm55_vm0, %v74_v13, 0.0  ;;  %v85_v17 = vsel %vm55_vm0, %v75_v14, 0.0 }
  0x19   :  { %v86_v18 = vadd.f32 %v85_v17, %v84_v16  ;;  %v78_v19 = vld.sshfl [vmem:[#allocation1 + $0x10] sm:$0xff pattern:$0x75316420]  ;;  %v79_v20 = vld.sshfl [vmem:[#allocation1 + $0x18] sm:$0xff pattern:$0x75316420] }
  0x1a   :  { %v89_v21 = vsel %vm55_vm0, %v78_v19, 0.0  ;;  %v90_v22 = vsel %vm55_vm0, %v79_v20, 0.0 }
  0x1b   :  { %87 = vadd.xlane.f32.xlu1 %v86_v18  ;;  %64 = vadd.xlane.f32.xlu0 %v63_v15  ;;  %v91_v23 = vadd.f32 %v90_v22, %v89_v21 }
  0x23   :  { %92 = vadd.xlane.f32.xlu1 %v91_v23 }
  0x86   :  { %v60_v24 = vpop.xlane.xlu0 %59 }
  0x87   :  { %v66_v28 = vsel %vm55_vm0, %v60_v24, 0.0 }
  0x8e   :  { %v88_v26 = vpop.xlane.xlu1 %87  ;;  %v65_v27 = vpop.xlane.xlu0 %64 }
  0x8f   :  { %v67_v29 = vsel %vm55_vm0, %v65_v27, 0.0  ;;  %v94_v37 = vsel %vm55_vm0, %v88_v26, 0.0 }
  0x90   :  { %v68_v31 = vadd.f32 %v67_v29, %v66_v28 }
  0x92   :  { %v97_v32 = vmul.f32 0.001953125, %v68_v31 }
  0x94   :  { %v144_v34 = vmul.f32 0.1, %v97_v32  ;;  %v99_v41 = vmul.f32 %v97_v32, %v97_v32 }
  0x96   :  { %v93_v35 = vpop.xlane.xlu1 %92  ;;  %v145_v36 = vadd.f32 %v144_v34, %v143_v33 }
  0x97   :  { %v95_v38 = vsel %vm55_vm0, %v93_v35, 0.0 }
  0x98   :  { %v96_v39 = vadd.f32 %v95_v38, %v94_v37  ;;  %154 = vrot.lane.b32.xlu1 %v145_v36, %s300_s29 }
  0x9a   :  { %v98_v40 = vmul.f32 0.001953125, %v96_v39 }
  0x9c   :  { %v100_v42 = vsub.f32 %v98_v40, %v99_v41 }
  0x9e   :  { %v101_v43 = vmax.f32 %v100_v42, 0.0 }
  0xa0   :  { %v102_v44 = vadd.f32 1e-05, %v101_v43  ;;  %v148_v59 = vmul.f32 0.1, %v101_v43 }
  0xa2   :  { %216 = vrsqrt.f32 %v102_v44  ;;  %vm109_vm2 = vweird.f32 %v102_v44  ;;  %v149_v60 = vadd.f32 %v148_v59, %v147_v58 }
  0xa8   :  { %v217_v45 = vpop.eup %216 }
  0xa9   :  { %v104_v46 = vmul.f32 %v217_v45, %v102_v44  ;;  %vm110_vm1 = vweird.f32 %v217_v45 }
  0xaa   :  { %vm111_vm3 = vmor %vm109_vm2, %vm110_vm1 }
  0xab   :  { %v105_v47 = vmul.f32 %v217_v45, %v104_v46 }
  0xad   :  { %v106_v48 = vmul.f32 0.5, %v105_v47 }
  0xaf   :  { %v107_v49 = vsub.f32 1.5, %v106_v48 }
  0xb1   :  { %v108_v50 = vmul.f32 %v217_v45, %v107_v49 }
  0xb3   :  { %v112_v52 = vsel %vm111_vm3, %v217_v45, %v108_v50 }
  0xb4   :  { %v114_v53 = vmul.f32 %v113_v51, %v112_v52 }
  0xb6   :  { %120 = vperm.xlu2 %214, %v114_v53   ;;  %v116_v55 = vmul.f32 %v114_v53, %v97_v32 }
  0xb8   :  { %v117_v56 = vsub.f32 %v115_v54, %v116_v55 }
  0xba   :  { %150 = vrot.lane.b32.xlu0 %v117_v56, %s301_s9 }
  0xbe   :  { %131 = vperm.xlu2 %214, %v117_v56  }
  0xc6   :  { %158 = vrot.lane.b32.xlu2 %v149_v60, %s302_s1 }
 0x110   :  { %v121_v63 = vpop.permute.xlu2 %120 }
 0x111   :  { %v125_v3 = vperm.slane %v121_v63, %v124_v2 }
 0x113   :  { %v127_v5 = vmul.f32 %v125_v3, %v347_v0  ;;  %v128_v6 = vmul.f32 %v125_v3, %v349_v1  ;;  %v155_v1 = vpop.permute.xlu1 %154 }
 0x118   :  { %v132_v4 = vpop.permute.xlu2 %131 }
 0x119   :  { %v136_v7 = vperm.slane %v132_v4, %v124_v2 }
 0x11b   :  { %v138_v8 = vadd.f32 %v136_v7, %v127_v5  ;;  %v139_v9 = vadd.f32 %v136_v7, %v128_v6 }
 0x11d   :  { %140 = vst [vmem:[#allocation5] sm:$0xff] %v138_v8 }
 0x11e   :  { %141 = vst [vmem:[#allocation5 + $0x8] sm:$0xff] %v139_v9 }
 0x11f   :  { %181 = dma.vmem_to_hbm [thread:$0]  %s174_s12, 256, %s176_s14, [#allocation4], %s297_s26, %s297_s26, %s298_s27  }
 0x120   :  { %v159_v11 = vpop.permute.xlu2 %158 }
 0x12c   :  { %v151_v0 = vpop.permute.xlu0 %150 }
 0x12d   :  { %v162_v10 = vsel %vm161_vm4, %v114_v53, %v151_v0 }
 0x12e   :  { %v164_v12 = vsel %vm163_vm5, %v162_v10, %v155_v1 }
 0x12f   :  { %v166_v13 = vsel %vm165_vm6, %v164_v12, %v159_v11 }
 0x130   :  { %168 = vst.msk [vmem:[#allocation6] sm:$0xf] %vm167_vm7, %v166_v13 }
 0x131   :  { %192 = dma.vmem_to_hbm [thread:$0]  %s188_s16, 64, %s190_s19, [#allocation7]  }
 0x132   :  { %292 = dma.done.wait [#allocation4], 256  }
 0x133   :  { %293 = vsyncadd [#allocation4], 4294967040 }
 0x134   :  { %294 = dma.done.wait [#allocation7], 64  }
 0x135   :  { %295 = vsyncadd [#allocation7], 4294967232 }
 0x136   :  { %201 = vsyncpa [#allocation3], 1 }
 0x137   :  { %202 = vsyncpa [#allocation4], 1 }
 0x138   :  { %203 = vsyncpa [#allocation7], 1 }

</bundles_post_ra>
